<compile_context>
chip_gen: v7x
topology: tpu7x:2x2x1
jax: 0.10.0
libtpu: 0.0.40
codegen_flags: <defaults>
</compile_context>

<pallas_src>
import jax
import jax.numpy as jnp
from jax import lax
from jax.experimental import pallas as pl
from jax.experimental.pallas import tpu as pltpu


# ----------------------------------------------------------------------------
# Pallas kernel: full dual-stream MLP (dueling combine pre-folded) on one tile.
# ----------------------------------------------------------------------------
def dueling_dqn_kernel(x_ref, w1_ref, w234_ref, b_ref, q_ref):
    # x_ref:    (TB, 128) int32 -- board tiled 3x: lanes 0..41, 42..83, 84..125
    #                              hold the 42 cells; lanes 126..127 sentinel 3.
    # w1_ref:   (128, 512) bf16 -- layer-1 weights, row 42*c + p <-> torch
    #                              flat one-hot feature p*3 + c;
    #                              cols [value(0:256) | adv(256:512)].
    # w234_ref: (896, 256) bf16 -- packed layers 2..4 (block-diagonal):
    #              rows   0..511, cols 0..255 : layer 2 (512 -> 256)
    #              rows 512..767, cols 0..127 : layer 3 (256 -> 128)
    #              rows 768..895, cols 0..6   : layer 4 with dueling combine folded in
    # b_ref:    (4, 512) f32    -- bias rows for layers 1..4 (zero padded);
    #                              row 3 lanes 0..6 already hold the combined Q bias.
    # q_ref:    (TB, 128) f32   -- Q values land in lanes 0..6 (rest zero).

    xb = x_ref[...]

    # One-hot in 128 lanes: lane l = 42*c + p is 1 iff board[p] == c.
    lane = lax.broadcasted_iota(jnp.int32, xb.shape, 1)
    cls = jnp.where(lane < 42, 0, jnp.where(lane < 84, 1, 2))
    x = jnp.where(xb == cls, 1.0, 0.0).astype(jnp.bfloat16)   # exact in bf16

    def dense(h_bf16, w_bf16, bias_f32):
        # bf16 x bf16 -> f32 accumulation: native MXU mode on v5e/v6e/v7x.
        return jnp.dot(h_bf16, w_bf16, preferred_element_type=jnp.float32) + bias_f32

    # layer 1: (TB,128) @ (128,512) -> [value(0:256) | adv(256:512)]
    h = dense(x, w1_ref[...], b_ref[0:1, 0:512])
    h = jnp.maximum(h, 0.0).astype(jnp.bfloat16)

    # layer 2: (TB,512) @ (512,256) block-diagonal
    h = dense(h, w234_ref[0:512, 0:256], b_ref[1:2, 0:256])
    h = jnp.maximum(h, 0.0).astype(jnp.bfloat16)

    # layer 3: (TB,256) @ (256,128) block-diagonal
    h = dense(h, w234_ref[512:768, 0:128], b_ref[2:3, 0:128])
    h = jnp.maximum(h, 0.0).astype(jnp.bfloat16)

    # layer 4: (TB,128) @ (128,128). Dueling combine is folded into the packed
    # weights, so lanes 0..6 are Q directly (lanes 7..127 are exact zeros).
    q_ref[...] = dense(h, w234_ref[768:896, 0:128], b_ref[3:4, 0:128])


# ----------------------------------------------------------------------------
# Wrapper: batch/lane padding + pallas_call with a batch grid.
# ----------------------------------------------------------------------------
@jax.jit
def dueling_dqn_forward(x_board, packed):
    w1, w234, biases = packed
    b = x_board.shape[0]

    bp = max(8, ((b + 7) // 8) * 8)          # pad batch to f32 sublane multiple
    tb = 256 if bp >= 256 else bp            # batch tile for the grid
    bp = ((bp + tb - 1) // tb) * tb          # pad batch to a multiple of tb

    # Tile the raw int32 board into lanes 0..41 / 42..83 / 84..125 so the
    # kernel can build the one-hot with a single lane-class compare.
    x_flat = x_board.reshape(b, 6 * 7).astype(jnp.int32)
    x_tiled = jnp.concatenate([x_flat, x_flat, x_flat], axis=1)     # (b, 126)
    x_pad = jnp.full((bp, 128), 3, jnp.int32)                       # sentinel 3
    x_pad = x_pad.at[:b, :126].set(x_tiled)

    flops = 2 * bp * (128 * 512 + 512 * 256 + 256 * 128 + 128 * 128)
    bytes_accessed = (x_pad.size * 4 + w1.size * 2 + w234.size * 2
                      + biases.size * 4 + bp * 128 * 4)

    q_pad = pl.pallas_call(
        dueling_dqn_kernel,
        out_shape=jax.ShapeDtypeStruct((bp, 128), jnp.float32),
        grid=(bp // tb,),
        in_specs=[
            pl.BlockSpec((tb, 128), lambda i: (i, 0)),    # x: batch-tiled
            pl.BlockSpec((128, 512), lambda i: (0, 0)),   # w1: VMEM-resident
            pl.BlockSpec((896, 256), lambda i: (0, 0)),   # w234: VMEM-resident
            pl.BlockSpec((4, 512), lambda i: (0, 0)),     # biases
        ],
        out_specs=pl.BlockSpec((tb, 128), lambda i: (i, 0)),
        compiler_params=pltpu.CompilerParams(
            dimension_semantics=("parallel",)),
        cost_estimate=pl.CostEstimate(flops=flops, transcendentals=0,
                                      bytes_accessed=bytes_accessed),
    )(x_pad, w1, w234, biases)

    return q_pad[:b, :7]


# ----------------------------------------------------------------------------
# Parameter init (PyTorch nn.Linear default U(-k, k), k = 1/sqrt(fan_in)).
# Logical weights stored (in_features, out_features); biases (1, out_features).
# ----------------------------------------------------------------------------
def init_params(key):
    layer_dims = [
        (126, 256), (256, 128), (128, 64), (64, 1),    # value stream
        (126, 256), (256, 128), (128, 64), (64, 7),    # advantage stream
    ]
    params = []
    for (fan_in, fan_out) in layer_dims:
        key, kw, kb = jax.random.split(key, 3)
        bound = 1.0 / jnp.sqrt(fan_in)
        w = jax.random.uniform(kw, (fan_in, fan_out), jnp.float32, -bound, bound)
        bvec = jax.random.uniform(kb, (1, fan_out), jnp.float32, -bound, bound)
        params.append((w, bvec))
    return params


# ----------------------------------------------------------------------------
# One-time packing: fuse the two streams into block-diagonal weights, fold the
# dueling combine into layer 4, collapse everything into 2 bf16 weight buffers
# + 1 f32 bias buffer.
# ----------------------------------------------------------------------------
def pack_params(params):
    (w1v, b1v), (w2v, b2v), (w3v, b3v), (w4v, b4v), \
        (w1a, b1a), (w2a, b2a), (w3a, b3a), (w4a, b4a) = params

    # layer 1: (128, 512). One-hot lane 42*c + p <-> torch flat feature p*3 + c.
    w1 = jnp.zeros((128, 512), jnp.float32)
    w1v_r = w1v.reshape(42, 3, 256)   # [p, c, :] == original row p*3 + c
    w1a_r = w1a.reshape(42, 3, 256)
    for c in range(3):
        w1 = w1.at[c * 42:(c + 1) * 42, 0:256].set(w1v_r[:, c, :])
        w1 = w1.at[c * 42:(c + 1) * 42, 256:512].set(w1a_r[:, c, :])

    # layers 2..4 packed block-diagonal into one (896, 256) buffer.
    w234 = jnp.zeros((896, 256), jnp.float32)
    # layer 2: 512 -> 256
    w234 = w234.at[0:256, 0:128].set(w2v)
    w234 = w234.at[256:512, 128:256].set(w2a)
    # layer 3: 256 -> 128
    w234 = w234.at[512:640, 0:64].set(w3v)
    w234 = w234.at[640:768, 64:128].set(w3a)
    # layer 4 with dueling combine folded in:
    #   Q_j = h3v @ w4v + h3a @ (w4a[:,j] - mean_k w4a[:,k])
    #         + b4v + b4a_j - mean_k b4a_k
    w4a_centered = w4a - jnp.mean(w4a, axis=1, keepdims=True)          # (64, 7)
    w234 = w234.at[768:832, 0:7].set(jnp.broadcast_to(w4v, (64, 7)))   # value rows
    w234 = w234.at[832:896, 0:7].set(w4a_centered)                     # adv rows

    # biases: (4, 512) f32, one row per layer, zero padded.
    biases = jnp.zeros((4, 512), jnp.float32)
    biases = biases.at[0, 0:256].set(b1v[0])
    biases = biases.at[0, 256:512].set(b1a[0])
    biases = biases.at[1, 0:128].set(b2v[0])
    biases = biases.at[1, 128:256].set(b2a[0])
    biases = biases.at[2, 0:64].set(b3v[0])
    biases = biases.at[2, 64:128].set(b3a[0])
    biases = biases.at[3, 0:7].set(b4v[0, 0] + (b4a[0] - jnp.mean(b4a[0])))

    return (w1.astype(jnp.bfloat16), w234.astype(jnp.bfloat16), biases)


# Pure-JAX f32 reference (mirrors the PyTorch module exactly).
def reference_forward(x_board, params):
    b = x_board.shape[0]
    x = jax.nn.one_hot(x_board.astype(jnp.int32), 3,
                       dtype=jnp.float32).reshape(b, 126)
    (w1v, b1v), (w2v, b2v), (w3v, b3v), (w4v, b4v), \
        (w1a, b1a), (w2a, b2a), (w3a, b3a), (w4a, b4a) = params
    hv = jax.nn.relu(x @ w1v + b1v)
    hv = jax.nn.relu(hv @ w2v + b2v)
    hv = jax.nn.relu(hv @ w3v + b3v)
    value = hv @ w4v + b4v
    ha = jax.nn.relu(x @ w1a + b1a)
    ha = jax.nn.relu(ha @ w2a + b2a)
    ha = jax.nn.relu(ha @ w3a + b3a)
    adv = ha @ w4a + b4a
    return value + (adv - adv.mean(axis=1, keepdims=True))


if __name__ == "__main__":
    key = jax.random.PRNGKey(0)
    key_params, key_x = jax.random.split(key)

    params = init_params(key_params)
    packed = pack_params(params)          # one-time packing (not per call)

    batch = 2
    x_board = jax.random.randint(key_x, (batch, 6, 7), 0, 3, dtype=jnp.int32)

    q = dueling_dqn_forward(x_board, packed)
    q = jax.block_until_ready(q)

    q_ref = reference_forward(x_board, params)
    assert q.shape == (batch, 7), q.shape
    # bf16 weights + bf16 activations on the MXU => small deviation from the
    # pure-f32 reference.
    assert jnp.allclose(q, q_ref, atol=5e-2, rtol=5e-2), (q, q_ref)

    print("KERNEL_OK")
</pallas_src>

<mosaic_0001>
module attributes {stable_mosaic.version = 11 : i64} {
  func.func @dueling_dqn_kernel(%arg0: i32, %arg1: memref<8x128xi32, #tpu.memory_space<vmem>>, %arg2: memref<128x512xbf16, #tpu.memory_space<vmem>>, %arg3: memref<896x256xbf16, #tpu.memory_space<vmem>>, %arg4: memref<4x512xf32, #tpu.memory_space<vmem>>, %arg5: memref<8x128xf32, #tpu.memory_space<vmem>>) attributes {dimension_semantics = [#tpu.dimension_semantics<parallel>], iteration_bounds = array<i64: 1>, scalar_prefetch = 0 : i64, scratch_operands = 0 : i64, tpu.core_type = #tpu.core_type<tc>, window_params = [{transform_indices = @transform_0, window_bounds = array<i64: 8, 128>}, {pipeline_mode = #tpu.pipeline_mode<synchronous>, transform_indices = @transform_1, window_bounds = array<i64: 128, 512>}, {pipeline_mode = #tpu.pipeline_mode<synchronous>, transform_indices = @transform_2, window_bounds = array<i64: 896, 256>}, {pipeline_mode = #tpu.pipeline_mode<synchronous>, transform_indices = @transform_3, window_bounds = array<i64: 4, 512>}, {transform_indices = @transform_4, window_bounds = array<i64: 8, 128>}]} {
    %c0 = arith.constant 0 : index
    %c0_0 = arith.constant 0 : index
    %0 = vector.load %arg1[%c0, %c0_0] : memref<8x128xi32, #tpu.memory_space<vmem>>, vector<8x128xi32>
    %1 = tpu.iota {dimensions = array<i32: 1>} : vector<8x128xi32>
    %c42_i32 = arith.constant 42 : i32
    %2 = vector.broadcast %c42_i32 : i32 to vector<8x128xi32>
    %3 = arith.cmpi slt, %1, %2 : vector<8x128xi32>
    %c84_i32 = arith.constant 84 : i32
    %4 = vector.broadcast %c84_i32 : i32 to vector<8x128xi32>
    %5 = arith.cmpi slt, %1, %4 : vector<8x128xi32>
    %c1_i32 = arith.constant 1 : i32
    %c2_i32 = arith.constant 2 : i32
    %6 = vector.broadcast %c1_i32 : i32 to vector<8x128xi32>
    %7 = vector.broadcast %c2_i32 : i32 to vector<8x128xi32>
    %8 = arith.select %5, %6, %7 : vector<8x128xi1>, vector<8x128xi32>
    %c0_i32 = arith.constant 0 : i32
    %9 = vector.broadcast %c0_i32 : i32 to vector<8x128xi32>
    %10 = arith.select %3, %9, %8 : vector<8x128xi1>, vector<8x128xi32>
    %11 = arith.cmpi eq, %0, %10 : vector<8x128xi32>
    %cst = arith.constant 1.000000e+00 : f32
    %cst_1 = arith.constant 0.000000e+00 : f32
    %12 = vector.broadcast %cst : f32 to vector<8x128xf32>
    %13 = vector.broadcast %cst_1 : f32 to vector<8x128xf32>
    %14 = arith.select %11, %12, %13 : vector<8x128xi1>, vector<8x128xf32>
    %15 = arith.truncf %14 : vector<8x128xf32> to vector<8x128xbf16>
    %c0_2 = arith.constant 0 : index
    %c0_3 = arith.constant 0 : index
    %16 = vector.load %arg2[%c0_2, %c0_3] : memref<128x512xbf16, #tpu.memory_space<vmem>>, vector<128x512xbf16>
    %c0_4 = arith.constant 0 : index
    %c0_5 = arith.constant 0 : index
    %17 = vector.load %arg4[%c0_4, %c0_5] : memref<4x512xf32, #tpu.memory_space<vmem>>, vector<1x512xf32>
    %cst_6 = arith.constant dense<0.000000e+00> : vector<8x512xf32>
    %18 = tpu.matmul %15, %16, %cst_6 {dimension_numbers = #tpu.dot_dimension_numbers<[1], [0], [0], [1], [0, 0, 1, 1], [], []>} : vector<8x128xbf16>, vector<128x512xbf16>, vector<8x512xf32> -> vector<8x512xf32>
    %19 = vector.broadcast %17 : vector<1x512xf32> to vector<8x512xf32>
    %20 = arith.addf %18, %19 : vector<8x512xf32>
    %cst_7 = arith.constant 0.000000e+00 : f32
    %21 = vector.broadcast %cst_7 : f32 to vector<8x512xf32>
    %22 = arith.maximumf %20, %21 : vector<8x512xf32>
    %23 = arith.truncf %22 : vector<8x512xf32> to vector<8x512xbf16>
    %c0_8 = arith.constant 0 : index
    %c0_9 = arith.constant 0 : index
    %24 = vector.load %arg3[%c0_8, %c0_9] : memref<896x256xbf16, #tpu.memory_space<vmem>>, vector<512x256xbf16>
    %c1 = arith.constant 1 : index
    %c0_10 = arith.constant 0 : index
    %25 = vector.load %arg4[%c1, %c0_10] : memref<4x512xf32, #tpu.memory_space<vmem>>, vector<1x256xf32>
    %cst_11 = arith.constant dense<0.000000e+00> : vector<8x256xf32>
    %26 = tpu.matmul %23, %24, %cst_11 {dimension_numbers = #tpu.dot_dimension_numbers<[1], [0], [0], [1], [0, 0, 1, 1], [], []>} : vector<8x512xbf16>, vector<512x256xbf16>, vector<8x256xf32> -> vector<8x256xf32>
    %27 = vector.broadcast %25 : vector<1x256xf32> to vector<8x256xf32>
    %28 = arith.addf %26, %27 : vector<8x256xf32>
    %cst_12 = arith.constant 0.000000e+00 : f32
    %29 = vector.broadcast %cst_12 : f32 to vector<8x256xf32>
    %30 = arith.maximumf %28, %29 : vector<8x256xf32>
    %31 = arith.truncf %30 : vector<8x256xf32> to vector<8x256xbf16>
    %c512 = arith.constant 512 : index
    %c0_13 = arith.constant 0 : index
    %32 = vector.load %arg3[%c512, %c0_13] : memref<896x256xbf16, #tpu.memory_space<vmem>>, vector<256x128xbf16>
    %c2 = arith.constant 2 : index
    %c0_14 = arith.constant 0 : index
    %33 = vector.load %arg4[%c2, %c0_14] : memref<4x512xf32, #tpu.memory_space<vmem>>, vector<1x128xf32>
    %cst_15 = arith.constant dense<0.000000e+00> : vector<8x128xf32>
    %34 = tpu.matmul %31, %32, %cst_15 {dimension_numbers = #tpu.dot_dimension_numbers<[1], [0], [0], [1], [0, 0, 1, 1], [], []>} : vector<8x256xbf16>, vector<256x128xbf16>, vector<8x128xf32> -> vector<8x128xf32>
    %35 = vector.broadcast %33 : vector<1x128xf32> to vector<8x128xf32>
    %36 = arith.addf %34, %35 : vector<8x128xf32>
    %cst_16 = arith.constant 0.000000e+00 : f32
    %37 = vector.broadcast %cst_16 : f32 to vector<8x128xf32>
    %38 = arith.maximumf %36, %37 : vector<8x128xf32>
    %39 = arith.truncf %38 : vector<8x128xf32> to vector<8x128xbf16>
    %c768 = arith.constant 768 : index
    %c0_17 = arith.constant 0 : index
    %40 = vector.load %arg3[%c768, %c0_17] : memref<896x256xbf16, #tpu.memory_space<vmem>>, vector<128x128xbf16>
    %c3 = arith.constant 3 : index
    %c0_18 = arith.constant 0 : index
    %41 = vector.load %arg4[%c3, %c0_18] : memref<4x512xf32, #tpu.memory_space<vmem>>, vector<1x128xf32>
    %cst_19 = arith.constant dense<0.000000e+00> : vector<8x128xf32>
    %42 = tpu.matmul %39, %40, %cst_19 {dimension_numbers = #tpu.dot_dimension_numbers<[1], [0], [0], [1], [0, 0, 1, 1], [], []>} : vector<8x128xbf16>, vector<128x128xbf16>, vector<8x128xf32> -> vector<8x128xf32>
    %43 = vector.broadcast %41 : vector<1x128xf32> to vector<8x128xf32>
    %44 = arith.addf %42, %43 : vector<8x128xf32>
    %c0_20 = arith.constant 0 : index
    %c0_21 = arith.constant 0 : index
    %45 = vector.load %arg5[%c0_20, %c0_21] : memref<8x128xf32, #tpu.memory_space<vmem>>, vector<8x128xf32>
    tpu.vector_store %arg5[%c0_20, %c0_21], %44 {strides = array<i32>} : memref<8x128xf32, #tpu.memory_space<vmem>>, vector<8x128xf32>,
    return
  }
  func.func @transform_0(%arg0: i32) -> (i32, i32) {
    %c0_i32 = arith.constant 0 : i32
    %c0_i32_0 = arith.constant 0 : i32
    return %arg0, %c0_i32 : i32, i32
  }
  func.func @transform_1(%arg0: i32) -> (i32, i32) {
    %c0_i32 = arith.constant 0 : i32
    %c0_i32_0 = arith.constant 0 : i32
    %c0_i32_1 = arith.constant 0 : i32
    return %c0_i32, %c0_i32_0 : i32, i32
  }
  func.func @transform_2(%arg0: i32) -> (i32, i32) {
    %c0_i32 = arith.constant 0 : i32
    %c0_i32_0 = arith.constant 0 : i32
    %c0_i32_1 = arith.constant 0 : i32
    return %c0_i32, %c0_i32_0 : i32, i32
  }
  func.func @transform_3(%arg0: i32) -> (i32, i32) {
    %c0_i32 = arith.constant 0 : i32
    %c0_i32_0 = arith.constant 0 : i32
    %c0_i32_1 = arith.constant 0 : i32
    return %c0_i32, %c0_i32_0 : i32, i32
  }
  func.func @transform_4(%arg0: i32) -> (i32, i32) {
    %c0_i32 = arith.constant 0 : i32
    %c0_i32_0 = arith.constant 0 : i32
    return %arg0, %c0_i32 : i32, i32
  }
}

</mosaic_0001>

<bundles_post_ra>
// kernel: dueling_dqn_forward.1
= control target key start
LH: loop header
LB: loop body
LE: loop exit
PB: predicated region body
PF: predicated region fallthrough
CT: control target
= control target key end

     0   :  { %9 = vsyncpa [#allocation3], 0  ;;  %s1657_s0 = inlined_call_operand.vmem [shape: s32[8,128], index: 0, kind: input, shape index: {}]   ;;  %s1658_s1 = inlined_call_operand.hbm [shape: bf16[128,512], index: 1, kind: input, shape index: {}]   ;;  %s1659_s2 = inlined_call_operand.hbm [shape: bf16[896,256], index: 2, kind: input, shape index: {}]   ;;  %s1660_s3 = inlined_call_operand.vmem [shape: f32[4,512], index: 3, kind: input, shape index: {}]   ;;  %s1661_s4 = inlined_call_operand.vmem [shape: f32[8,128], index: 4, kind: output, shape index: {}]  }
   0x1   :  { %10 = vsyncpa [#allocation5], 0  ;;  %s1545_s15 = smov [#allocation2]   ;;  %s1497_s19 = scalar_lea.hbm %s1658_s1, 4096 }
   0x2   :  { %s18_s16 = sshll.u32 %s1545_s15, 4  ;;  %p1498_p0 = scmp.ne.s32.totalorder %s1658_s1, %s1497_s19  ;;  %s19_s16 = int_to_ptr.vmem [resolvable:$true] %s18_s16 }
   0x3   :  { %p1501_p1 = scmp.lt.u32.totalorder %s1497_s19, %s1658_s1 }
   0x5   :  { %p1503_p2 = pnand %p1501_p1, %p1498_p0 }
   0x7   :  { %1506 = shalt.err (!%p1503_p2)
}
   0x8   :  { %s1507_s24 = scalar_lea.vmem %s19_s16, 4096  ;;  %p1512_p4 = scmp.lt.s32.totalorder %s19_s16, %s19_s16 }
   0x9   :  { %p1508_p3 = scmp.ne.s32.totalorder %s19_s16, %s1507_s24  ;;  %p1513_p5 = scmp.lt.s32.totalorder %s1507_s24, %s1507_s24 }
   0xb   :  { %p1514_p6 = por %p1513_p5, %p1512_p4 }
   0xd   :  { %p1515_p7 = pnand %p1514_p6, %p1508_p3 }
   0xf   :  { %1518 = shalt.err (!%p1515_p7)
}
  0x10   :  { %s1546_s25 = smov 256   ;;  %s1547_s26 = smov 16  }
  0x11   :  { %24 = dma.hbm_to_vmem [thread:$0]  %s1658_s1, 4096, %s19_s16, [#allocation3], %s1546_s25, %s1546_s25, %s1547_s26  }
  0x12   :  { %s1548_s29 = smov [#allocation4]   ;;  %s1519_s7 = scalar_lea.hbm %s1659_s2, 14336 }
  0x13   :  { %s30_s30 = sshll.u32 %s1548_s29, 4  ;;  %p1520_p8 = scmp.ne.s32.totalorder %s1659_s2, %s1519_s7  ;;  %s31_s30 = int_to_ptr.vmem [resolvable:$true] %s30_s30 }
  0x14   :  { %p1523_p9 = scmp.lt.u32.totalorder %s1519_s7, %s1659_s2 }
  0x16   :  { %p1525_p10 = pnand %p1523_p9, %p1520_p8 }
  0x18   :  { %1528 = shalt.err (!%p1525_p10)
}
  0x19   :  { %s1529_s12 = scalar_lea.vmem %s31_s30, 14336  ;;  %p1534_p12 = scmp.lt.s32.totalorder %s31_s30, %s31_s30 }
  0x1a   :  { %p1530_p11 = scmp.ne.s32.totalorder %s31_s30, %s1529_s12  ;;  %p1535_p13 = scmp.lt.s32.totalorder %s1529_s12, %s1529_s12 }
  0x1c   :  { %p1536_p0 = por %p1535_p13, %p1534_p12 }
  0x1e   :  { %p1537_p1 = pnand %p1536_p0, %p1530_p11 }
  0x20   :  { %1540 = shalt.err (!%p1537_p1)
}
  0x21   :  { %s1549_s1 = smov 128   ;;  %s1550_s13 = smov 8  }
  0x22   :  { %36 = dma.hbm_to_vmem [thread:$0]  %s1659_s2, 14336, %s31_s30, [#allocation5], %s1549_s1, %s1549_s1, %s1550_s13  }
  0x23   :  { %1541 = dma.done.wait [#allocation3], 4096  }
  0x24   :  { %1542 = vsyncadd [#allocation3], 4294963200 }
  0x25   :  { %1543 = dma.done.wait [#allocation5], 14336  }
  0x26   :  { %1544 = vsyncadd [#allocation5], 4294952960  ;;  %v1551_v0 = vmov 0   ;;  %v1329_v1 = vld [vmem:[#allocation2 + $0x4] ss:$16 sps:$4 sm:$0xff]   ;;  %v47_v9 = vlaneseq  ;;  %v1552_v17 = vmov 2  }
  0x27   :  { %302 = vmatprep.mubr.bf16.mxu1 %v1551_v0  ;;  %v1331_v2 = vld [vmem:[#allocation2] ss:$16 sps:$4 sm:$0xff]   ;;  %270 = vmatprep.subr.bf16.mxu1 %v1329_v1  ;;  %v1332_v3 = vld [vmem:[#allocation2 + $0x24] ss:$16 sps:$4 sm:$0xff]   ;;  %v1355_v28 = vld [vmem:[#allocation2 + $0xc] ss:$16 sps:$4 sm:$0xff]  }
  0x28   :  { %271 = vmatpush1.bf16.msra.mxu1 %v1331_v2  ;;  %v1334_v4 = vld [vmem:[#allocation2 + $0x20] ss:$16 sps:$4 sm:$0xff]   ;;  %v1335_v5 = vld [vmem:[#allocation2 + $0x44] ss:$16 sps:$4 sm:$0xff]   ;;  %v48_v12 = vand.u32 127, %v47_v9  ;;  %vm1555_vm4 = vmmov 0  }
  0x29   :  { %272 = vmatprep.subr.bf16.mxu1 %v1332_v3  ;;  %v1337_v6 = vld [vmem:[#allocation2 + $0x40] ss:$16 sps:$4 sm:$0xff]   ;;  %v1338_v7 = vld [vmem:[#allocation2 + $0x64] ss:$16 sps:$4 sm:$0xff]   ;;  %v1353_v29 = vld [vmem:[#allocation2 + $0x8] ss:$16 sps:$4 sm:$0xff]  }
  0x2a   :  { %v1340_v8 = vld [vmem:[#allocation2 + $0x60] ss:$16 sps:$4 sm:$0xff]   ;;  %v1341_v10 = vld [vmem:[#allocation2 + $0x84] ss:$16 sps:$4 sm:$0xff]   ;;  %vm50_vm0 = vcmp.lt.s32.totalorder %v48_v12, 84  ;;  %vm49_vm1 = vcmp.lt.s32.totalorder %v48_v12, 42 }
  0x2b   :  { %v1343_v11 = vld [vmem:[#allocation2 + $0x80] ss:$16 sps:$4 sm:$0xff]   ;;  %v1344_v13 = vld [vmem:[#allocation2 + $0xa4] ss:$16 sps:$4 sm:$0xff]   ;;  %v51_v18 = vsel %vm50_vm0, 1, %v1552_v17 }
  0x2c   :  { %273 = vmatpush1.bf16.msra.mxu1 %v1334_v4  ;;  %v1346_v14 = vld [vmem:[#allocation2 + $0xa0] ss:$16 sps:$4 sm:$0xff]   ;;  %v1347_v15 = vld [vmem:[#allocation2 + $0xc4] ss:$16 sps:$4 sm:$0xff]   ;;  %v52_v24 = vsel %vm49_vm1, 0, %v51_v18 }
  0x2d   :  { %274 = vmatprep.subr.bf16.mxu1 %v1335_v5  ;;  %v1349_v16 = vld [vmem:[#allocation2 + $0xc0] ss:$16 sps:$4 sm:$0xff]   ;;  %v1377_v19 = vld [vmem:[#allocation4 + $0x4] ss:$8 sps:$4 sm:$0xff]   ;;  %v1380_v22 = vld [vmem:[#allocation4 + $0x14] ss:$8 sps:$4 sm:$0xff]  }
  0x2e   :  { %v1379_v20 = vld [vmem:[#allocation4] ss:$8 sps:$4 sm:$0xff]   ;;  %v1350_v21 = vld [vmem:[#allocation2 + $0xe4] ss:$16 sps:$4 sm:$0xff]   ;;  %757 = vmatprep.subr.bf16.mxu0 %v1377_v19  ;;  %v1382_v25 = vld [vmem:[#allocation4 + $0x10] ss:$8 sps:$4 sm:$0xff]  }
  0x2f   :  { %v46_v23 = vld [vmem:[%s1657_s0] sm:$0xff]  ;;  %758 = vmatpush1.bf16.msra.mxu0 %v1379_v20  ;;  %v1386_v31 = vld [vmem:[#allocation4 + $0x34] ss:$8 sps:$4 sm:$0xff]   ;;  %v1388_v34 = vld [vmem:[#allocation4 + $0x30] ss:$8 sps:$4 sm:$0xff]  }
  0x30   :  { %275 = vmatpush1.bf16.msra.mxu1 %v1337_v6  ;;  %759 = vmatprep.subr.bf16.mxu0 %v1380_v22  ;;  %v1383_v26 = vld [vmem:[#allocation4 + $0x24] ss:$8 sps:$4 sm:$0xff]   ;;  %v1352_v27 = vld [vmem:[#allocation2 + $0xe0] ss:$16 sps:$4 sm:$0xff]   ;;  %vm53_vm2 = vcmp.eq.s32.totalorder %v46_v23, %v52_v24  ;;  %v1553_v35 = vmov 1.0|1.0  }
  0x31   :  { %276 = vmatprep.subr.bf16.mxu1 %v1338_v7  ;;  %v1385_v30 = vld [vmem:[#allocation4 + $0x20] ss:$8 sps:$4 sm:$0xff]   ;;  %vm1610_vm3 = vmpackc.low %vm53_vm2, %vm53_vm2  ;;  %v1358_v33 = vld [vmem:[#allocation2 + $0x2c] ss:$16 sps:$4 sm:$0xff]   ;;  %v1622_v23 = vshrl.u32 %v47_v9, 7 }
  0x32   :  { %v1389_v36 = vld [vmem:[#allocation4 + $0x44] ss:$8 sps:$4 sm:$0xff]   ;;  %v1356_v37 = vld [vmem:[#allocation2 + $0x28] ss:$16 sps:$4 sm:$0xff]   ;;  %v1392_v40 = vld [vmem:[#allocation4 + $0x54] ss:$8 sps:$4 sm:$0xff]  }
  0x33   :  { %760 = vmatpush1.bf16.msra.mxu0 %v1382_v25  ;;  %v1361_v38 = vld [vmem:[#allocation2 + $0x4c] ss:$16 sps:$4 sm:$0xff]   ;;  %v1391_v39 = vld [vmem:[#allocation4 + $0x40] ss:$8 sps:$4 sm:$0xff]   ;;  %v1394_v43 = vld [vmem:[#allocation4 + $0x50] ss:$8 sps:$4 sm:$0xff]  }
  0x34   :  { %277 = vmatpush1.bf16.msra.mxu1 %v1340_v8  ;;  %761 = vmatprep.subr.bf16.mxu0 %v1383_v26  ;;  %v1359_v41 = vld [vmem:[#allocation2 + $0x48] ss:$16 sps:$4 sm:$0xff]   ;;  %v1364_v42 = vld [vmem:[#allocation2 + $0x6c] ss:$16 sps:$4 sm:$0xff]   ;;  %v92_v24 = vsub.s32 0, %v1622_v23  ;;  %v96_v26 = vsub.s32 1, %v1622_v23 }
  0x35   :  { %278 = vmatprep.subr.bf16.mxu1 %v1341_v10  ;;  %v1362_v44 = vld [vmem:[#allocation2 + $0x68] ss:$16 sps:$4 sm:$0xff]   ;;  %v1395_v45 = vld [vmem:[#allocation4 + $0x64] ss:$8 sps:$4 sm:$0xff]   ;;  %v1398_v48 = vld [vmem:[#allocation4 + $0x74] ss:$8 sps:$4 sm:$0xff]  }
  0x36   :  { %v1367_v46 = vld [vmem:[#allocation2 + $0x8c] ss:$16 sps:$4 sm:$0xff]   ;;  %v1397_v47 = vld [vmem:[#allocation4 + $0x60] ss:$8 sps:$4 sm:$0xff]   ;;  %v1400_v51 = vld [vmem:[#allocation4 + $0x70] ss:$8 sps:$4 sm:$0xff]  }
  0x37   :  { %762 = vmatpush1.bf16.msra.mxu0 %v1385_v30  ;;  %v1365_v49 = vld [vmem:[#allocation2 + $0x88] ss:$16 sps:$4 sm:$0xff]   ;;  %v1370_v50 = vld [vmem:[#allocation2 + $0xac] ss:$16 sps:$4 sm:$0xff]  }
  0x38   :  { %279 = vmatpush1.bf16.msra.mxu1 %v1343_v11  ;;  %763 = vmatprep.subr.bf16.mxu0 %v1386_v31  ;;  %v1401_v52 = vld [vmem:[#allocation4 + $0x84] ss:$8 sps:$4 sm:$0xff]   ;;  %v1368_v53 = vld [vmem:[#allocation2 + $0xa8] ss:$16 sps:$4 sm:$0xff]   ;;  %v1404_v56 = vld [vmem:[#allocation4 + $0x94] ss:$8 sps:$4 sm:$0xff]  }
  0x39   :  { %280 = vmatprep.subr.bf16.mxu1 %v1344_v13  ;;  %v1373_v54 = vld [vmem:[#allocation2 + $0xcc] ss:$16 sps:$4 sm:$0xff]   ;;  %v1403_v55 = vld [vmem:[#allocation4 + $0x80] ss:$8 sps:$4 sm:$0xff]   ;;  %v1406_v59 = vld [vmem:[#allocation4 + $0x90] ss:$8 sps:$4 sm:$0xff]  }
  0x3a   :  { %v1371_v57 = vld [vmem:[#allocation2 + $0xc8] ss:$16 sps:$4 sm:$0xff]   ;;  %v1376_v58 = vld [vmem:[#allocation2 + $0xec] ss:$16 sps:$4 sm:$0xff]  }
  0x3b   :  { %764 = vmatpush1.bf16.msra.mxu0 %v1388_v34  ;;  %v1407_v60 = vld [vmem:[#allocation4 + $0xa4] ss:$8 sps:$4 sm:$0xff]   ;;  %v1374_v61 = vld [vmem:[#allocation2 + $0xe8] ss:$16 sps:$4 sm:$0xff]   ;;  %v1410_v63 = vld [vmem:[#allocation4 + $0xb4] ss:$8 sps:$4 sm:$0xff]  }
  0x3c   :  { %281 = vmatpush1.bf16.msra.mxu1 %v1346_v14  ;;  %765 = vmatprep.subr.bf16.mxu0 %v1389_v36  ;;  %v1409_v62 = vld [vmem:[#allocation4 + $0xa0] ss:$8 sps:$4 sm:$0xff]   ;;  %v1413_v1 = vld [vmem:[#allocation4 + $0xc4] ss:$8 sps:$4 sm:$0xff]   ;;  %v1416_v3 = vld [vmem:[#allocation4 + $0xd4] ss:$8 sps:$4 sm:$0xff]  }
  0x3d   :  { %282 = vmatprep.subr.bf16.mxu1 %v1347_v15  ;;  %v1415_v2 = vld [vmem:[#allocation4 + $0xc0] ss:$8 sps:$4 sm:$0xff]   ;;  %v1418_v4 = vld [vmem:[#allocation4 + $0xd0] ss:$8 sps:$4 sm:$0xff]   ;;  %v1419_v5 = vld [vmem:[#allocation4 + $0xe4] ss:$8 sps:$4 sm:$0xff]  }
  0x3e   :  { %v1421_v6 = vld [vmem:[#allocation4 + $0xe0] ss:$8 sps:$4 sm:$0xff]   ;;  %v1422_v7 = vld [vmem:[#allocation4 + $0xf4] ss:$8 sps:$4 sm:$0xff]   ;;  %v1424_v8 = vld [vmem:[#allocation4 + $0xf0] ss:$8 sps:$4 sm:$0xff]  }
  0x3f   :  { %766 = vmatpush1.bf16.msra.mxu0 %v1391_v39  ;;  %v1427_v10 = vld [vmem:[#allocation4 + $0x104] ss:$8 sps:$4 sm:$0xff]   ;;  %v1473_v11 = vld [vmem:[#allocation4 + $0x280] ss:$8 sps:$4 sm:$0xff]   ;;  %v1475_v13 = vld [vmem:[#allocation4 + $0x290] ss:$8 sps:$4 sm:$0xff]  }
  0x40   :  { %283 = vmatpush1.bf16.msra.mxu1 %v1349_v16  ;;  %767 = vmatprep.subr.bf16.mxu0 %v1392_v40  ;;  %v1474_v12 = vld [vmem:[#allocation4 + $0x200] ss:$8 sps:$4 sm:$0xff]   ;;  %v1476_v14 = vld [vmem:[#allocation4 + $0x210] ss:$8 sps:$4 sm:$0xff]   ;;  %v1430_v39 = vld [vmem:[#allocation4 + $0x114] ss:$8 sps:$4 sm:$0xff]  }
  0x41   :  { %284 = vmatprep.subr.bf16.mxu1 %v1350_v21  ;;  %v1477_v15 = vld [vmem:[#allocation4 + $0x2a0] ss:$8 sps:$4 sm:$0xff]   ;;  %v1479_v17 = vld [vmem:[#allocation4 + $0x2b0] ss:$8 sps:$4 sm:$0xff]  }
  0x42   :  { %v1478_v16 = vld [vmem:[#allocation4 + $0x220] ss:$8 sps:$4 sm:$0xff]   ;;  %v1480_v18 = vld [vmem:[#allocation4 + $0x230] ss:$8 sps:$4 sm:$0xff]  }
  0x43   :  { %768 = vmatpush1.bf16.msra.mxu0 %v1394_v43  ;;  %v1481_v19 = vld [vmem:[#allocation4 + $0x2c0] ss:$8 sps:$4 sm:$0xff]   ;;  %v1483_v21 = vld [vmem:[#allocation4 + $0x2d0] ss:$8 sps:$4 sm:$0xff]   ;;  %v1436_v43 = vld [vmem:[#allocation4 + $0x134] ss:$8 sps:$4 sm:$0xff]  }
  0x44   :  { %285 = vmatpush1.bf16.msra.mxu1 %v1352_v27  ;;  %769 = vmatprep.subr.bf16.mxu0 %v1395_v45  ;;  %v1482_v20 = vld [vmem:[#allocation4 + $0x240] ss:$8 sps:$4 sm:$0xff]   ;;  %v1484_v22 = vld [vmem:[#allocation4 + $0x250] ss:$8 sps:$4 sm:$0xff]   ;;  %v1439_v45 = vld [vmem:[#allocation4 + $0x144] ss:$8 sps:$4 sm:$0xff]  }
  0x45   :  { %311 = vmatprep.subr.bf16.mxu1 %v1355_v28  ;;  %v1628_v25 = vld [vmem:[%s1660_s3] ss:$4 sm:$0xf]  ;;  %v1428_v40 = vld [vmem:[#allocation4 + $0x110] ss:$8 sps:$4 sm:$0xff]  }
  0x46   :  { %v93_v27 = vrot.slane %v1628_v25, %v92_v24  ;;  %v97_v28 = vrot.slane %v1628_v25, %v96_v26 }
  0x47   :  { %1167 = vmatmul.mubr.msk.bf16.vlgmr.msra.gmra.mrb[0].mxu1 %vm1610_vm3, %v1553_v35  ;;  %770 = vmatpush1.bf16.msra.mxu0 %v1397_v47  ;;  %v1442_v47 = vld [vmem:[#allocation4 + $0x154] ss:$8 sps:$4 sm:$0xff]  }
  0x48   :  { %312 = vmatpush1.bf16.msra.mxu1 %v1353_v29  ;;  %343 = vmatprep.mubr.bf16.mxu1 %v1551_v0  ;;  %v1412_v0 = vld [vmem:[#allocation4 + $0xb0] ss:$8 sps:$4 sm:$0xff]  }
  0x49   :  { %313 = vmatprep.subr.bf16.mxu1 %v1358_v33  ;;  %771 = vmatprep.subr.bf16.mxu0 %v1398_v48  ;;  %v1440_v48 = vld [vmem:[#allocation4 + $0x150] ss:$8 sps:$4 sm:$0xff]  }
  0x4b   :  { %772 = vmatpush1.bf16.msra.mxu0 %v1400_v51  ;;  %v1443_v51 = vld [vmem:[#allocation4 + $0x160] ss:$8 sps:$4 sm:$0xff]  }
  0x4c   :  { %314 = vmatpush1.bf16.msra.mxu1 %v1356_v37  ;;  %773 = vmatprep.subr.bf16.mxu0 %v1401_v52  ;;  %v1425_v37 = vld [vmem:[#allocation4 + $0x100] ss:$8 sps:$4 sm:$0xff]  }
  0x4d   :  { %315 = vmatprep.subr.bf16.mxu1 %v1361_v38 }
  0x4f   :  { %774 = vmatpush1.bf16.msra.mxu0 %v1403_v55 }
  0x50   :  { %316 = vmatpush1.bf16.msra.mxu1 %v1359_v41  ;;  %775 = vmatprep.subr.bf16.mxu0 %v1404_v56  ;;  %v1433_v41 = vld [vmem:[#allocation4 + $0x124] ss:$8 sps:$4 sm:$0xff]   ;;  %v1446_v56 = vld [vmem:[#allocation4 + $0x170] ss:$8 sps:$4 sm:$0xff]  }
  0x51   :  { %317 = vmatprep.subr.bf16.mxu1 %v1364_v42  ;;  %v1431_v42 = vld [vmem:[#allocation4 + $0x120] ss:$8 sps:$4 sm:$0xff]  }
  0x53   :  { %776 = vmatpush1.bf16.msra.mxu0 %v1406_v59  ;;  %v1451_v59 = vld [vmem:[#allocation4 + $0x184] ss:$8 sps:$4 sm:$0xff]  }
  0x54   :  { %318 = vmatpush1.bf16.msra.mxu1 %v1362_v44  ;;  %777 = vmatprep.subr.bf16.mxu0 %v1407_v60  ;;  %v1434_v44 = vld [vmem:[#allocation4 + $0x130] ss:$8 sps:$4 sm:$0xff]  }
  0x55   :  { %319 = vmatprep.subr.bf16.mxu1 %v1367_v46  ;;  %v1437_v46 = vld [vmem:[#allocation4 + $0x140] ss:$8 sps:$4 sm:$0xff]  }
  0x57   :  { %778 = vmatpush1.bf16.msra.mxu0 %v1409_v62  ;;  %v1449_v62 = vld [vmem:[#allocation4 + $0x180] ss:$8 sps:$4 sm:$0xff]  }
  0x58   :  { %320 = vmatpush1.bf16.msra.mxu1 %v1365_v49  ;;  %779 = vmatprep.subr.bf16.mxu0 %v1410_v63  ;;  %v104_v49 = vsub.s32 3, %v1622_v23 }
  0x59   :  { %321 = vmatprep.subr.bf16.mxu1 %v1370_v50  ;;  %v1445_v50 = vld [vmem:[#allocation4 + $0x164] ss:$8 sps:$4 sm:$0xff]  }
  0x5a   :  { %v105_v52 = vrot.slane %v1628_v25, %v104_v49 }
  0x5b   :  { %780 = vmatpush1.bf16.msra.mxu0 %v1412_v0  ;;  %v1454_v0 = vld [vmem:[#allocation4 + $0x194] ss:$8 sps:$4 sm:$0xff]  }
  0x5c   :  { %322 = vmatpush1.bf16.msra.mxu1 %v1368_v53  ;;  %781 = vmatprep.subr.bf16.mxu0 %v1413_v1  ;;  %v1448_v53 = vld [vmem:[#allocation4 + $0x174] ss:$8 sps:$4 sm:$0xff]   ;;  %v1452_v1 = vld [vmem:[#allocation4 + $0x190] ss:$8 sps:$4 sm:$0xff]  }
  0x5d   :  { %323 = vmatprep.subr.bf16.mxu1 %v1373_v54 }
  0x5f   :  { %782 = vmatpush1.bf16.msra.mxu0 %v1415_v2  ;;  %v1457_v2 = vld [vmem:[#allocation4 + $0x1a4] ss:$8 sps:$4 sm:$0xff]  }
  0x60   :  { %324 = vmatpush1.bf16.msra.mxu1 %v1371_v57  ;;  %783 = vmatprep.subr.bf16.mxu0 %v1416_v3  ;;  %v1455_v3 = vld [vmem:[#allocation4 + $0x1a0] ss:$8 sps:$4 sm:$0xff]  }
  0x61   :  { %325 = vmatprep.subr.bf16.mxu1 %v1376_v58 }
  0x63   :  { %784 = vmatpush1.bf16.msra.mxu0 %v1418_v4  ;;  %v1460_v4 = vld [vmem:[#allocation4 + $0x1b4] ss:$8 sps:$4 sm:$0xff]  }
  0x64   :  { %326 = vmatpush1.bf16.msra.mxu1 %v1374_v61  ;;  %785 = vmatprep.subr.bf16.mxu0 %v1419_v5  ;;  %v1458_v5 = vld [vmem:[#allocation4 + $0x1b0] ss:$8 sps:$4 sm:$0xff]  }
  0x65   :  { %1261 = vmatprep.subr.bf16.mxu1 %v1473_v11  ;;  %v1464_v11 = vld [vmem:[#allocation4 + $0x1d0] ss:$8 sps:$4 sm:$0xff]  }
  0x67   :  { %1169 = vmatmul.mubr.msk.bf16.vlgmr.msra.gmra.mrb[4].mxu1 %vm1610_vm3, %v1553_v35  ;;  %786 = vmatpush1.bf16.msra.mxu0 %v1421_v6  ;;  %v1463_v6 = vld [vmem:[#allocation4 + $0x1c4] ss:$8 sps:$4 sm:$0xff]  }
  0x68   :  { %787 = vmatprep.subr.bf16.mxu0 %v1422_v7  ;;  %1262 = vmatpush3.bf16.msra.mxu1 %v1474_v12  ;;  %v1461_v7 = vld [vmem:[#allocation4 + $0x1c0] ss:$8 sps:$4 sm:$0xff]  }
  0x69   :  { %1263 = vmatprep.subr.bf16.mxu1 %v1475_v13  ;;  %v1469_v13 = vld [vmem:[#allocation4 + $0x1e4] ss:$8 sps:$4 sm:$0xff]  }
  0x6b   :  { %788 = vmatpush1.bf16.msra.mxu0 %v1424_v8  ;;  %v100_v8 = vsub.s32 2, %v1622_v23  ;;  %v1492_v23 = vld [vmem:[#allocation4 + $0x330] ss:$8 sps:$4 sm:$0xff]  }
  0x6c   :  { %798 = vmatprep.subr.bf16.mxu0 %v1427_v10  ;;  %1264 = vmatpush3.bf16.msra.mxu1 %v1476_v14  ;;  %v1466_v10 = vld [vmem:[#allocation4 + $0x1d4] ss:$8 sps:$4 sm:$0xff]   ;;  %v1467_v14 = vld [vmem:[#allocation4 + $0x1e0] ss:$8 sps:$4 sm:$0xff]  }
  0x6d   :  { %1265 = vmatprep.subr.bf16.mxu1 %v1477_v15  ;;  %v101_v12 = vrot.slane %v1628_v25, %v100_v8  ;;  %v1488_v25 = vld [vmem:[#allocation4 + $0x270] ss:$8 sps:$4 sm:$0xff]  }
  0x70   :  { %1266 = vmatpush3.bf16.msra.mxu1 %v1478_v16  ;;  %v1472_v16 = vld [vmem:[#allocation4 + $0x1f4] ss:$8 sps:$4 sm:$0xff]  }
  0x71   :  { %1267 = vmatprep.subr.bf16.mxu1 %v1479_v17  ;;  %v1470_v17 = vld [vmem:[#allocation4 + $0x1f0] ss:$8 sps:$4 sm:$0xff]  }
  0x74   :  { %1268 = vmatpush3.bf16.msra.mxu1 %v1480_v18 }
  0x75   :  { %1269 = vmatprep.subr.bf16.mxu1 %v1481_v19 }
  0x78   :  { %1270 = vmatpush3.bf16.msra.mxu1 %v1482_v20  ;;  %v1485_v20 = vld [vmem:[#allocation4 + $0x2e0] ss:$8 sps:$4 sm:$0xff]  }
  0x79   :  { %1271 = vmatprep.subr.bf16.mxu1 %v1483_v21  ;;  %v1486_v21 = vld [vmem:[#allocation4 + $0x260] ss:$8 sps:$4 sm:$0xff]  }
  0x7c   :  { %1272 = vmatpush3.bf16.msra.mxu1 %v1484_v22  ;;  %v1487_v22 = vld [vmem:[#allocation4 + $0x2f0] ss:$8 sps:$4 sm:$0xff]  }
  0x7d   :  { %1273 = vmatprep.subr.bf16.mxu1 %v1485_v20 }
  0x80   :  { %1274 = vmatpush3.bf16.msra.mxu1 %v1486_v21 }
  0x81   :  { %1275 = vmatprep.subr.bf16.mxu1 %v1487_v22 }
  0x84   :  { %1276 = vmatpush3.bf16.msra.mxu1 %v1488_v25 }
 0x11a   :  { %v304_v29 = vpop.f32.mrb[0].mxu1 }
 0x11b   :  { %v305_v9 = vadd.f32 %v304_v29, %v93_v27  ;;  %v306_v30 = vpop.f32.mrb[1].mxu1  ;;  %v1554_v27 = vmov 0.0  }
 0x11c   :  { %v307_v31 = vadd.f32 %v306_v30, %v97_v28  ;;  %v308_v32 = vpop.f32.mrb[2].mxu1  ;;  %1292 = vmatprep.subr.bf16.mxu1 %v1554_v27  ;;  %v1170_v28 = vld [vmem:[%s1660_s3 + $0x1] ss:$4 sm:$0x3] }
 0x11d   :  { %v352_v33 = vmax.f32 %v305_v9, 0.0  ;;  %v309_v34 = vpop.f32.mrb[3].mxu1  ;;  %v430_v29 = vrot.slane %v1170_v28, %v92_v24  ;;  %v434_v9 = vrot.slane %v1170_v28, %v96_v26  ;;  %v1491_v24 = vld [vmem:[#allocation4 + $0x320] ss:$8 sps:$4 sm:$0xff]  }
 0x11e   :  { %v353_v35 = vmax.f32 %v307_v31, 0.0  ;;  %v1493_v26 = vld [vmem:[#allocation4 + $0x340] ss:$8 sps:$4 sm:$0xff]  }
 0x11f   :  { %v356_v38 = vpack.c.bf16 %v352_v33, %v352_v33 }
 0x120   :  { %v357_v36 = vpack.c.bf16 %v353_v35, %v353_v35 }
 0x122   :  { %789 = vmatprep.mubr.bf16.mxu0 %v357_v36 }
 0x123   :  { %790 = vmatmul.mubr.bf16.vlgmr.msra.gmra.mrb[0].mxu0 %v356_v38 }
 0x124   :  { %799 = vmatpush1.bf16.msra.mxu0 %v1425_v37 }
 0x125   :  { %800 = vmatprep.subr.bf16.mxu0 %v1430_v39  ;;  %v1489_v39 = vld [vmem:[#allocation4 + $0x300] ss:$8 sps:$4 sm:$0xff]  }
 0x128   :  { %801 = vmatpush1.bf16.msra.mxu0 %v1428_v40 }
 0x129   :  { %802 = vmatprep.subr.bf16.mxu0 %v1433_v41  ;;  %v1490_v41 = vld [vmem:[#allocation4 + $0x310] ss:$8 sps:$4 sm:$0xff]  }
 0x12c   :  { %803 = vmatpush1.bf16.msra.mxu0 %v1431_v42  ;;  %v1494_v42 = vld [vmem:[#allocation4 + $0x350] ss:$8 sps:$4 sm:$0xff]  }
 0x12d   :  { %804 = vmatprep.subr.bf16.mxu0 %v1436_v43  ;;  %v1495_v43 = vld [vmem:[#allocation4 + $0x360] ss:$8 sps:$4 sm:$0xff]  }
 0x130   :  { %805 = vmatpush1.bf16.msra.mxu0 %v1434_v44  ;;  %v1496_v44 = vld [vmem:[#allocation4 + $0x370] ss:$8 sps:$4 sm:$0xff]  }
 0x131   :  { %806 = vmatprep.subr.bf16.mxu0 %v1439_v45 }
 0x134   :  { %807 = vmatpush1.bf16.msra.mxu0 %v1437_v46  ;;  %v1235_v46 = vld [vmem:[%s1660_s3 + $0x2] ss:$0 sm:$0xff] }
 0x135   :  { %808 = vmatprep.subr.bf16.mxu0 %v1442_v47 }
 0x138   :  { %809 = vmatpush1.bf16.msra.mxu0 %v1440_v48 }
 0x139   :  { %810 = vmatprep.subr.bf16.mxu0 %v1445_v50 }
 0x13a   :  { %v345_v54 = vpop.f32.mrb[4].mxu1 }
 0x13b   :  { %v347_v55 = vpop.f32.mrb[5].mxu1  ;;  %v346_v15 = vadd.f32 %v345_v54, %v101_v12  ;;  %v1252_v54 = vld [vmem:[%s1660_s3 + $0x3] ss:$0 sm:$0xff] }
 0x13c   :  { %811 = vmatpush1.bf16.msra.mxu0 %v1443_v51  ;;  %v348_v57 = vadd.f32 %v347_v55, %v105_v52  ;;  %v349_v58 = vpop.f32.mrb[6].mxu1 }
 0x13d   :  { %812 = vmatprep.subr.bf16.mxu0 %v1448_v53  ;;  %v350_v60 = vpop.f32.mrb[7].mxu1  ;;  %v354_v18 = vmax.f32 %v346_v15, 0.0 }
 0x13e   :  { %v355_v61 = vmax.f32 %v348_v57, 0.0 }
 0x13f   :  { %v358_v19 = vpack.c.bf16 %v354_v18, %v354_v18 }
 0x140   :  { %813 = vmatpush1.bf16.msra.mxu0 %v1446_v56  ;;  %v359_v63 = vpack.c.bf16 %v355_v61, %v355_v61 }
 0x141   :  { %814 = vmatprep.subr.bf16.mxu0 %v1451_v59 }
 0x142   :  { %830 = vmatprep.mubr.bf16.mxu0 %v359_v63 }
 0x144   :  { %815 = vmatpush1.bf16.msra.mxu0 %v1449_v62 }
 0x145   :  { %816 = vmatprep.subr.bf16.mxu0 %v1454_v0 }
 0x148   :  { %817 = vmatpush1.bf16.msra.mxu0 %v1452_v1 }
 0x149   :  { %818 = vmatprep.subr.bf16.mxu0 %v1457_v2 }
 0x14c   :  { %819 = vmatpush1.bf16.msra.mxu0 %v1455_v3 }
 0x14d   :  { %820 = vmatprep.subr.bf16.mxu0 %v1460_v4 }
 0x150   :  { %821 = vmatpush1.bf16.msra.mxu0 %v1458_v5 }
 0x151   :  { %822 = vmatprep.subr.bf16.mxu0 %v1463_v6 }
 0x154   :  { %823 = vmatpush1.bf16.msra.mxu0 %v1461_v7 }
 0x155   :  { %824 = vmatprep.subr.bf16.mxu0 %v1466_v10 }
 0x158   :  { %825 = vmatpush1.bf16.msra.mxu0 %v1464_v11 }
 0x159   :  { %826 = vmatprep.subr.bf16.mxu0 %v1469_v13 }
 0x15c   :  { %827 = vmatpush1.bf16.msra.mxu0 %v1467_v14 }
 0x15d   :  { %828 = vmatprep.subr.bf16.mxu0 %v1472_v16 }
 0x160   :  { %829 = vmatpush1.bf16.msra.mxu0 %v1470_v17 }
 0x163   :  { %831 = vmatmul.mubr.bf16.vlgmr.msra.gmra.mrb[0].mxu0 %v358_v19 }
 0x236   :  { %v832_v30 = vpop.f32.mrb[0].mxu0 }
 0x237   :  { %v1312_v31 = vadd.f32 %v832_v30, %v430_v29  ;;  %v834_v32 = vpop.f32.mrb[1].mxu0 }
 0x238   :  { %v1313_v33 = vadd.f32 %v834_v32, %v434_v9  ;;  %v836_v34 = vpop.f32.mrb[2].mxu0 }
 0x239   :  { %v839_v35 = vmax.f32 %v1312_v31, 0.0  ;;  %v837_v36 = vpop.f32.mrb[3].mxu0 }
 0x23a   :  { %v840_v37 = vmax.f32 %v1313_v33, 0.0 }
 0x23b   :  { %v841_v40 = vpack.c.bf16 %v839_v35, %v839_v35 }
 0x23c   :  { %v842_v38 = vpack.c.bf16 %v840_v37, %v840_v37 }
 0x23e   :  { %1008 = vmatprep.mubr.bf16.mxu1 %v842_v38 }
 0x23f   :  { %1009 = vmatmul.mubr.bf16.vlgmr.msra.gmra.mrb[8].mxu1 %v841_v40 }
 0x240   :  { %1293 = vmatpush3.bf16.msra.mxu1 %v1489_v39  ;;  %1308 = vmatprep.mubr.msk.bf16.mxu1 %vm1555_vm4, %v1554_v27 }
 0x241   :  { %1294 = vmatprep.subr.bf16.mxu1 %v1554_v27 }
 0x244   :  { %1295 = vmatpush3.bf16.msra.mxu1 %v1490_v41 }
 0x245   :  { %1296 = vmatprep.subr.bf16.mxu1 %v1554_v27 }
 0x248   :  { %1297 = vmatpush3.bf16.msra.mxu1 %v1491_v24 }
 0x249   :  { %1298 = vmatprep.subr.bf16.mxu1 %v1554_v27 }
 0x24c   :  { %1299 = vmatpush3.bf16.msra.mxu1 %v1492_v23 }
 0x24d   :  { %1300 = vmatprep.subr.bf16.mxu1 %v1554_v27 }
 0x250   :  { %1301 = vmatpush3.bf16.msra.mxu1 %v1493_v26 }
 0x251   :  { %1302 = vmatprep.subr.bf16.mxu1 %v1554_v27 }
 0x254   :  { %1303 = vmatpush3.bf16.msra.mxu1 %v1494_v42 }
 0x255   :  { %1304 = vmatprep.subr.bf16.mxu1 %v1554_v27 }
 0x258   :  { %1305 = vmatpush3.bf16.msra.mxu1 %v1495_v43 }
 0x259   :  { %1306 = vmatprep.subr.bf16.mxu1 %v1554_v27 }
 0x25c   :  { %1307 = vmatpush3.bf16.msra.mxu1 %v1496_v44 }
 0x312   :  { %v1277_v45 = vpop.f32.mrb[8].mxu1 }
 0x313   :  { %v1278_v47 = vpop.f32.mrb[9].mxu1 }
 0x314   :  { %v1279_v48 = vadd.f32 %v1278_v47, %v1277_v45  ;;  %v1280_v49 = vpop.f32.mrb[10].mxu1 }
 0x315   :  { %v1281_v50 = vpop.f32.mrb[11].mxu1 }
 0x316   :  { %v1011_v51 = vadd.f32 %v1279_v48, %v1235_v46 }
 0x318   :  { %v1016_v52 = vmax.f32 %v1011_v51, 0.0 }
 0x31a   :  { %v1017_v53 = vpack.c.bf16 %v1016_v52, %v1016_v52 }
 0x31c   :  { %1309 = vmatmul.mubr.bf16.vlgmr.msra.gmra.mrb[12].mxu1 %v1017_v53 }
 0x3ef   :  { %v1121_v55 = vpop.f32.mrb[12].mxu1 }
 0x3f0   :  { %v1122_v56 = vadd.f32 %v1252_v54, %v1121_v55  ;;  %v1310_v57 = vpop.f32.mrb[13].mxu1 }
 0x3f1   :  { %v1124_v58 = vpop.f32.mrb[14].mxu1 }
 0x3f2   :  { %1127 = vst [vmem:[%s1661_s4] sm:$0xff] %v1122_v56  ;;  %v1311_v59 = vpop.f32.mrb[15].mxu1 }
 0x3f3   :  { %1132 = vsyncpa [#allocation3], 1 }
 0x3f4   :  { %1133 = vsyncpa [#allocation5], 1 }

</bundles_post_ra>
